<compile_context>
chip_gen: v7x
topology: tpu7x:2x2x1
jax: 0.10.0
libtpu: 0.0.40
codegen_flags: <defaults>
</compile_context>

<pallas_src>
import functools

import jax
import jax.numpy as jnp
from jax.experimental import pallas as pl
from jax.experimental.pallas import tpu as pltpu


def _head_kernel(x_ref, w_ref, b_ref, y_ref, prob_ref, loss_ref, *, rem):
    # x_ref:    (TB, F)  features tile, native HBM layout / native dtype
    # w_ref:    (F, 1)   float32 weight column
    # b_ref:    (1,)     float32 bias scalar in SMEM
    # y_ref:    (1, TB)  float32 labels tile (batch on lanes)
    # prob_ref: (1, TB)  float32 sigmoid output tile (lane-dense)
    # loss_ref: (1, 128) float32 per-tile BCE partial sum (splat across lanes)
    # rem:      static python int, B % TB (0 => every tile is full)

    # TODO(synk): nn.Dropout is identity in eval mode; training-mode masking not implemented.

    # features.float() once at load, then relayout batch-on-lanes *inside* the
    # kernel.  The XLU transpose is overlapped with the next tile's DMA by the
    # BlockSpec pipeline, so it replaces (for free) the wrapper-level HBM transpose.
    x = x_ref[...].astype(jnp.float32)                     # (TB, F)
    xt = jnp.transpose(x)                                  # (F, TB)
    w = w_ref[...]                                         # (F, 1)
    b = b_ref[0]                                           # scalar bias from SMEM

    # Linear projection as dense VPU multiply + sublane reduce.  An (TB,F)@(F,1)
    # MXU matmul (N=1) would waste the MXU and leave logits in a 1-lane layout.
    z = jnp.sum(xt * w, axis=0, keepdims=True) + b         # (1, TB) logits

    # One shared EUP exp feeds both the sigmoid output and the BCE log term.
    e = jnp.exp(-jnp.abs(z))                               # exp(-|z|) in (0, 1]
    inv = 1.0 / (1.0 + e)                                  # exact divide (sigmoid parity)
    prob = jnp.where(z >= 0.0, inv, e * inv)               # numerically stable sigmoid
    prob_ref[...] = prob

    # BCE directly from logits (softplus form): max(z,0) - y*z + log(1+exp(-|z|)).
    y = y_ref[...]
    per_ex = jnp.maximum(z, 0.0) - y * z + jnp.log(1.0 + e)

    def _partial(vals):
        # Scalar tile-sum, splat across a lane-dense (1, 128) output block.
        return jnp.broadcast_to(jnp.sum(vals, keepdims=True), (1, 128))

    if rem == 0:
        # All tiles full: no lane masking anywhere.
        loss_ref[...] = _partial(per_ex)
    else:
        # Only the final ragged tile pays the iota/compare/select mask; the mask
        # also protects the sum from NaN/garbage in the padded lanes.
        i = pl.program_id(0)
        last = pl.num_programs(0) - 1

        @pl.when(i < last)
        def _():
            loss_ref[...] = _partial(per_ex)

        @pl.when(i == last)
        def _():
            lane = jax.lax.broadcasted_iota(jnp.int32, per_ex.shape, 1)
            loss_ref[...] = _partial(jnp.where(lane < rem, per_ex, 0.0))


def classification_head(features, labels, weight, bias, *, tb=32768):
    """features: (B, F) any float dtype; labels: (B,); weight: (1, F) torch layout;
    bias: (1,).  Returns (loss, prob) matching Model.forward(features, labels)."""
    B, F = features.shape

    # Tiny side operands -> working layouts (negligible HBM traffic).  The large
    # (B, F) features array is passed straight through in its native layout.
    w_col = weight.reshape(F, 1).astype(jnp.float32)       # (F, 1)
    b_sc = bias.reshape(1).astype(jnp.float32)             # (1,)  -> SMEM scalar
    y_row = labels.astype(jnp.float32).reshape(1, B)       # (1, B)

    # Batch tile: whole batch if it fits one tile, else a multiple of 128 lanes.
    # Default 32768 => 4 MiB f32 features tile (8 MiB double-buffered), which
    # amortizes the ~0.35 us per-step overhead to >90% of the HBM roofline on
    # v6e/v7x; the vmem limit below leaves room for the in-kernel transposed copy
    # (and covers the v5e 16 MiB scoped default).
    if B <= tb:
        TB = B
    else:
        TB = max(128, (tb // 128) * 128)
    num_tiles = pl.cdiv(B, TB)
    rem = B % TB  # 0 in the single-tile case (TB == B)

    kernel = functools.partial(_head_kernel, rem=rem)

    prob_row, loss_parts = pl.pallas_call(
        kernel,
        out_shape=(
            jax.ShapeDtypeStruct((1, B), jnp.float32),
            jax.ShapeDtypeStruct((1, num_tiles * 128), jnp.float32),
        ),
        grid_spec=pl.GridSpec(
            grid=(num_tiles,),
            in_specs=[
                # Features in native (B, F) layout.  (If DMA is still exposed on
                # v7x after the TB bump, pipeline_mode=pl.Buffered(3) is the next lever.)
                pl.BlockSpec((TB, F), lambda i: (i, 0)),
                pl.BlockSpec((F, 1), lambda i: (0, 0)),               # weight column
                pl.BlockSpec(memory_space=pltpu.MemorySpace.SMEM),    # bias scalar
                pl.BlockSpec((1, TB), lambda i: (0, i)),              # labels tile
            ],
            out_specs=[
                pl.BlockSpec((1, TB), lambda i: (0, i)),              # prob (lane-dense)
                pl.BlockSpec((1, 128), lambda i: (0, i)),             # per-tile loss partials
            ],
        ),
        compiler_params=pltpu.CompilerParams(
            # Per-tile partials -> no cross-iteration accumulator, so the batch axis
            # is safely megacore-parallel (2x on v7x, neutral on v5e/v6e).
            dimension_semantics=("parallel",),
            vmem_limit_bytes=48 * 1024 * 1024,
        ),
    )(features, w_col, b_sc, y_row)

    loss = jnp.sum(loss_parts[0, ::128]) / B               # sum of per-tile sums / B
    return loss, prob_row.reshape(B, 1)


if __name__ == "__main__":
    key = jax.random.PRNGKey(0)

    def run_case(B, FEAT, tb, dtype):
        k_x, k_w, k_b, k_y = jax.random.split(jax.random.fold_in(key, B), 4)
        features = jax.random.normal(k_x, (B, FEAT), dtype=jnp.float32).astype(dtype)
        labels = (jax.random.uniform(k_y, (B,)) > 0.5).astype(jnp.float32)

        # nn.Linear(feature_size, 1) style init: uniform(-1/sqrt(F), 1/sqrt(F)).
        bound = 1.0 / (FEAT ** 0.5)
        weight = jax.random.uniform(k_w, (1, FEAT), minval=-bound, maxval=bound,
                                    dtype=jnp.float32)
        bias = jax.random.uniform(k_b, (1,), minval=-bound, maxval=bound,
                                  dtype=jnp.float32)

        loss, prob = classification_head(features, labels, weight, bias, tb=tb)
        jax.block_until_ready((loss, prob))

        # Pure-JAX reference (elementwise f32 math, same as the kernel).
        x32 = features.astype(jnp.float32)
        logits_ref = jnp.sum(x32 * weight.reshape(1, FEAT), axis=-1, keepdims=True) + bias[0]
        prob_ref = jax.nn.sigmoid(logits_ref)
        y_col = labels.reshape(B, 1)
        loss_ref = jnp.mean(-(y_col * jnp.log(prob_ref)
                              + (1.0 - y_col) * jnp.log(1.0 - prob_ref)))

        assert jnp.allclose(prob, prob_ref, atol=1e-5, rtol=1e-5), f"prob mismatch B={B}"
        assert jnp.allclose(loss, loss_ref, atol=1e-5, rtol=1e-5), f"loss mismatch B={B}"

    # Small shape consistent with the module: batch=8, feature_size=32 (single tile).
    run_case(8, 32, 8192, jnp.float32)
    # Two full tiles: rem == 0 -> unmasked fast path, 2 grid steps.
    run_case(256, 32, 128, jnp.float32)
    # Ragged path: 3 grid steps, last tile masked; bf16 features exercise the
    # native-dtype DMA + in-kernel cast.
    run_case(320, 32, 128, jnp.bfloat16)

    print("KERNEL_OK")
</pallas_src>

<mosaic_0001>
module attributes {stable_mosaic.version = 11 : i64} {
  func.func @_head_kernel(%arg0: i32, %arg1: memref<8x32xf32, #tpu.memory_space<vmem>>, %arg2: memref<32x1xf32, #tpu.memory_space<vmem>>, %arg3: memref<1xf32, #tpu.memory_space<smem>>, %arg4: memref<1x8xf32, #tpu.memory_space<vmem>>, %arg5: memref<1x8xf32, #tpu.memory_space<vmem>>, %arg6: memref<1x128xf32, #tpu.memory_space<vmem>>) attributes {dimension_semantics = [#tpu.dimension_semantics<parallel>], iteration_bounds = array<i64: 1>, scalar_prefetch = 0 : i64, scratch_operands = 0 : i64, tpu.core_type = #tpu.core_type<tc>, window_params = [{transform_indices = @transform_0, window_bounds = array<i64: 8, 32>}, {pipeline_mode = #tpu.pipeline_mode<synchronous>, transform_indices = @transform_1, window_bounds = array<i64: 32, 1>}, {transform_indices = @transform_2, window_bounds = array<i64: 1>}, {transform_indices = @transform_3, window_bounds = array<i64: 1, 8>}, {transform_indices = @transform_4, window_bounds = array<i64: 1, 8>}, {transform_indices = @transform_5, window_bounds = array<i64: 1, 128>}]} {
    %c0 = arith.constant 0 : index
    %c0_0 = arith.constant 0 : index
    %0 = vector.load %arg1[%c0, %c0_0] : memref<8x32xf32, #tpu.memory_space<vmem>>, vector<8x32xf32>
    %1 = tpu.transpose %0, [1, 0] : vector<8x32xf32> -> vector<32x8xf32>
    %c0_1 = arith.constant 0 : index
    %c0_2 = arith.constant 0 : index
    %2 = vector.load %arg2[%c0_1, %c0_2] : memref<32x1xf32, #tpu.memory_space<vmem>>, vector<32x1xf32>
    %c0_3 = arith.constant 0 : index
    %3 = memref.load %arg3[%c0_3] : memref<1xf32, #tpu.memory_space<smem>>
    %4 = vector.broadcast %2 : vector<32x1xf32> to vector<32x8xf32>
    %5 = arith.mulf %1, %4 : vector<32x8xf32>
    %cst = arith.constant dense<0.000000e+00> : vector<8xf32>
    %6 = vector.multi_reduction <add>, %5, %cst [0] : vector<32x8xf32> to vector<8xf32>
    %7 = vector.shape_cast %6 : vector<8xf32> to vector<1x8xf32>
    %8 = vector.broadcast %3 : f32 to vector<1x8xf32>
    %9 = arith.addf %7, %8 : vector<1x8xf32>
    %10 = math.absf %9 : vector<1x8xf32>
    %cst_4 = arith.constant 0.000000e+00 : f32
    %11 = vector.broadcast %cst_4 : f32 to vector<1x8xf32>
    %12 = arith.subf %11, %10 : vector<1x8xf32>
    %13 = math.exp %12 : vector<1x8xf32>
    %cst_5 = arith.constant 1.000000e+00 : f32
    %14 = vector.broadcast %cst_5 : f32 to vector<1x8xf32>
    %15 = arith.addf %14, %13 : vector<1x8xf32>
    %cst_6 = arith.constant 1.000000e+00 : f32
    %16 = vector.broadcast %cst_6 : f32 to vector<1x8xf32>
    %17 = arith.divf %16, %15 : vector<1x8xf32>
    %cst_7 = arith.constant 0.000000e+00 : f32
    %18 = vector.broadcast %cst_7 : f32 to vector<1x8xf32>
    %19 = arith.cmpf oge, %9, %18 : vector<1x8xf32>
    %20 = arith.mulf %13, %17 : vector<1x8xf32>
    %21 = arith.select %19, %17, %20 : vector<1x8xi1>, vector<1x8xf32>
    %c0_8 = arith.constant 0 : index
    %c0_9 = arith.constant 0 : index
    %22 = vector.load %arg5[%c0_8, %c0_9] : memref<1x8xf32, #tpu.memory_space<vmem>>, vector<1x8xf32>
    tpu.vector_store %arg5[%c0_8, %c0_9], %21 {strides = array<i32>} : memref<1x8xf32, #tpu.memory_space<vmem>>, vector<1x8xf32>,
    %c0_10 = arith.constant 0 : index
    %c0_11 = arith.constant 0 : index
    %23 = vector.load %arg4[%c0_10, %c0_11] : memref<1x8xf32, #tpu.memory_space<vmem>>, vector<1x8xf32>
    %cst_12 = arith.constant 0.000000e+00 : f32
    %24 = vector.broadcast %cst_12 : f32 to vector<1x8xf32>
    %25 = arith.maximumf %9, %24 : vector<1x8xf32>
    %26 = arith.mulf %23, %9 : vector<1x8xf32>
    %27 = arith.subf %25, %26 : vector<1x8xf32>
    %cst_13 = arith.constant 1.000000e+00 : f32
    %28 = vector.broadcast %cst_13 : f32 to vector<1x8xf32>
    %29 = arith.addf %28, %13 : vector<1x8xf32>
    %30 = math.log %29 : vector<1x8xf32>
    %31 = arith.addf %27, %30 : vector<1x8xf32>
    %32 = vector.shape_cast %31 : vector<1x8xf32> to vector<1x1x8xf32>
    %cst_14 = arith.constant dense<0.000000e+00> : vector<1xf32>
    %33 = vector.multi_reduction <add>, %32, %cst_14 [1, 2] : vector<1x1x8xf32> to vector<1xf32>
    %34 = vector.shape_cast %33 : vector<1xf32> to vector<1x1x1xf32>
    %35 = vector.extract %34[0, 0, 0] : f32 from vector<1x1x1xf32>
    %36 = vector.broadcast %35 : f32 to vector<1x1xf32>
    %37 = vector.shape_cast %36 : vector<1x1xf32> to vector<1x1xf32>
    %38 = vector.broadcast %37 : vector<1x1xf32> to vector<1x128xf32>
    %c0_15 = arith.constant 0 : index
    %c0_16 = arith.constant 0 : index
    %39 = vector.load %arg6[%c0_15, %c0_16] : memref<1x128xf32, #tpu.memory_space<vmem>>, vector<1x128xf32>
    tpu.vector_store %arg6[%c0_15, %c0_16], %38 {strides = array<i32>} : memref<1x128xf32, #tpu.memory_space<vmem>>, vector<1x128xf32>,
    return
  }
  func.func @transform_0(%arg0: i32) -> (i32, i32) {
    %c0_i32 = arith.constant 0 : i32
    %c0_i32_0 = arith.constant 0 : i32
    return %arg0, %c0_i32 : i32, i32
  }
  func.func @transform_1(%arg0: i32) -> (i32, i32) {
    %c0_i32 = arith.constant 0 : i32
    %c0_i32_0 = arith.constant 0 : i32
    %c0_i32_1 = arith.constant 0 : i32
    return %c0_i32, %c0_i32_0 : i32, i32
  }
  func.func @transform_2(%arg0: i32) -> i32 {
    %c0_i32 = arith.constant 0 : i32
    %c0_i32_0 = arith.constant 0 : i32
    return %c0_i32 : i32
  }
  func.func @transform_3(%arg0: i32) -> (i32, i32) {
    %c0_i32 = arith.constant 0 : i32
    %c0_i32_0 = arith.constant 0 : i32
    return %c0_i32, %arg0 : i32, i32
  }
  func.func @transform_4(%arg0: i32) -> (i32, i32) {
    %c0_i32 = arith.constant 0 : i32
    %c0_i32_0 = arith.constant 0 : i32
    return %c0_i32, %arg0 : i32, i32
  }
  func.func @transform_5(%arg0: i32) -> (i32, i32) {
    %c0_i32 = arith.constant 0 : i32
    %c0_i32_0 = arith.constant 0 : i32
    return %c0_i32, %arg0 : i32, i32
  }
}

</mosaic_0001>

<bundles_post_ra>
// kernel: tpu_custom_call.1
= control target key start
LH: loop header
LB: loop body
LE: loop exit
PB: predicated region body
PF: predicated region fallthrough
CT: control target
= control target key end

     0   :  { %12 = vsyncpa [#allocation4], 0  ;;  %v221_v1 = vmov 0   ;;  %s299_s0 = inlined_call_operand.vmem [shape: f32[8,32], index: 0, kind: input, shape index: {}]   ;;  %s300_s1 = inlined_call_operand.vmem [shape: f32[32,1], index: 1, kind: input, shape index: {}]   ;;  %s301_s2 = inlined_call_operand.<no memory space> [shape: f32[1], index: 2, kind: input, shape index: {}]   ;;  %s302_s3 = inlined_call_operand.vmem [shape: f32[1,8], index: 3, kind: input, shape index: {}]   ;;  %s303_s4 = inlined_call_operand.hbm [shape: f32[1,8], index: 4, kind: output, shape index: {0}]   ;;  %s304_s5 = inlined_call_operand.hbm [shape: f32[1,128], index: 5, kind: output, shape index: {1}]  }
   0x1   :  { %v55_v0 = vld [vmem:[%s300_s1] sm:$0xff]  ;;  %165 = vset.pattern.permute.xlu0 %v221_v1  ;;  %166 = vset.pattern.permute.xlu1 %v221_v1  ;;  %v57_v2 = vld [vmem:[%s300_s1 + $0x10] sm:$0xff] }
   0x2   :  { %13 = vsyncpa [#allocation6], 0  ;;  %62 = vperm.xlu0 %165, %v55_v0   ;;  %72 = vperm.xlu1 %166, %v57_v2   ;;  %v56_v3 = vld [vmem:[%s300_s1 + $0x8] sm:$0xff]  ;;  %v58_v4 = vld [vmem:[%s300_s1 + $0x18] sm:$0xff]  ;;  %vm84_vm0 = vcmask 64512   ;;  %v98_v30 = vstv %s301_s2  ;;  %vm110_vm1 = vcmask 57344  }
   0x3   :  { %v22_v5 = vld [vmem:[%s299_s0] sm:$0xff]  ;;  %s222_s2 = smov [#allocation3]  }
   0x4   :  { %v112_v38 = vld [vmem:[%s302_s3] sm:$0x1]  ;;  %s137_s30 = sshll.u32 %s222_s2, 4  ;;  %s138_s30 = int_to_ptr.vmem [resolvable:$true] %s137_s30 }
   0x5   :  { %s173_s6 = scalar_lea.vmem %s138_s30, 16  ;;  %s177_s3 = scalar_lea.vmem %s138_s30, 32 }
   0x6   :  { %67 = vperm.xlu0 %165, %v56_v3   ;;  %77 = vperm.xlu1 %166, %v58_v4   ;;  %p174_p0 = scmp.ne.s32.totalorder %s138_s30, %s173_s6  ;;  %p178_p1 = scmp.lt.s32.totalorder %s138_s30, %s138_s30 }
   0x7   :  { %p179_p2 = scmp.lt.s32.totalorder %s177_s3, %s173_s6 }
   0x9   :  { %p180_p3 = por %p179_p2, %p178_p1 }
   0xb   :  { %p181_p4 = pnand %p180_p3, %p174_p0 }
  0x24   :  { %23 = vxpose.xlu0.b32.start.end [1/1] (short) (narrow) %v22_v5, 32 }
  0x81   :  { %v63_v6 = vpop.permute.xlu0 %62  ;;  %v73_v11 = vpop.permute.xlu1 %72 }
  0x85   :  { %v68_v7 = vpop.permute.xlu0 %67  ;;  %v78_v19 = vpop.permute.xlu1 %77 }
  0xa4   :  { %v39_v8 = vpop.trf.xlu0 }
  0xa5   :  { %v80_v12 = vmul.f32 %v63_v6, %v39_v8 }
  0xa7   :  { %v85_v16 = vsel %vm84_vm0, %v80_v12, 0.0 }
  0xa8   :  { %v40_v9 = vpop.trf.xlu0 }
  0xa9   :  { %v81_v10 = vmul.f32 %v68_v7, %v40_v9 }
  0xab   :  { %v86_v14 = vsel %vm84_vm0, %v81_v10, 0.0 }
  0xac   :  { %v41_v13 = vpop.trf.xlu0  ;;  %v87_v18 = vadd.f32 %v86_v14, %v85_v16 }
  0xad   :  { %v82_v15 = vmul.f32 %v73_v11, %v41_v13 }
  0xaf   :  { %v88_v17 = vsel %vm84_vm0, %v82_v15, 0.0 }
  0xb0   :  { %v42_v20 = vpop.trf.xlu0  ;;  %v89_v22 = vadd.f32 %v88_v17, %v87_v18 }
  0xb1   :  { %v83_v21 = vmul.f32 %v78_v19, %v42_v20 }
  0xb3   :  { %v90_v23 = vsel %vm84_vm0, %v83_v21, 0.0 }
  0xb4   :  { %v91_v24 = vadd.f32 %v90_v23, %v89_v22 }
  0xb6   :  { %v92_v25 = vrot.slane %v91_v24, 4 }
  0xb8   :  { %v93_v26 = vadd.f32 %v92_v25, %v91_v24 }
  0xba   :  { %v94_v27 = vrot.slane %v93_v26, 2 }
  0xbc   :  { %v95_v28 = vadd.f32 %v94_v27, %v93_v26 }
  0xbe   :  { %v96_v29 = vrot.slane %v95_v28, 1 }
  0xc0   :  { %v97_v31 = vadd.f32 %v96_v29, %v95_v28 }
  0xc2   :  { %v99_v32 = vadd.f32 %v98_v30, %v97_v31 }
  0xc4   :  { %v100_v33 = vand.u32 2147483647, %v99_v32  ;;  %v113_v39 = vmax.f32 %v99_v32, 0.0  ;;  %v114_v40 = vmul.f32 %v112_v38, %v99_v32  ;;  %vm107_vm2 = vcmp.ge.f32.partialorder %v99_v32, 0.0 }
  0xc6   :  { %v101_v34 = vsub.f32 0.0, %v100_v33  ;;  %v115_v43 = vsub.f32 %v113_v39, %v114_v40 }
  0xc8   :  { %v102_v35 = vmul.f32 1.442695, %v101_v34 }
  0xca   :  { %167 = vpow2.f32 %v102_v35 }
  0xd4   :  { %v168_v36 = vpop.eup %167 }
  0xd5   :  { %v104_v37 = vadd.f32 1.0, %v168_v36 }
  0xd7   :  { %169 = vlog2.f32 %v104_v37 }
  0xd8   :  { %171 = vrcp.f32 %v104_v37 }
  0xe1   :  { %v170_v41 = vpop.eup %169 }
  0xe2   :  { %v172_v42 = vpop.eup %171  ;;  %v117_v44 = vmul.f32 0.6931472, %v170_v41 }
  0xe3   :  { %v108_v45 = vmul.f32 %v172_v42, %v168_v36 }
  0xe4   :  { %v118_v46 = vadd.f32 %v117_v44, %v115_v43 }
  0xe5   :  { %v109_v47 = vsel %vm107_vm2, %v172_v42, %v108_v45 }
  0xe6   :  { %v119_v48 = vsel %vm110_vm1, %v118_v46, 0.0  ;;  %111 = vst.msk [vmem:[#allocation3] sm:$0x1] %vm110_vm1, %v109_v47 }
  0xe7   :  { %120 = vadd.xlane.f32.xlu1 %v119_v48 }
  0xe8   :  { %184 = shalt.err (!%p181_p4)
}
  0xe9   :  { %s185_s9 = scalar_lea.hbm %s303_s4, 16 }
  0xea   :  { %p186_p5 = scmp.ne.s32.totalorder %s303_s4, %s185_s9  ;;  %p189_p6 = scmp.lt.u32.totalorder %s185_s9, %s303_s4 }
  0xec   :  { %p191_p7 = pnand %p189_p6, %p186_p5 }
  0xee   :  { %194 = shalt.err (!%p191_p7)
}
  0xef   :  { %140 = dma.vmem_to_hbm [thread:$0]  %s138_s30, 16, %s303_s4, [#allocation4]  }
  0xf0   :  { %s223_s16 = smov [#allocation5]  }
  0xf1   :  { %s147_s17 = sshll.u32 %s223_s16, 4  ;;  %s148_s17 = int_to_ptr.vmem [resolvable:$true] %s147_s17 }
  0xf2   :  { %s195_s19 = scalar_lea.vmem %s148_s17, 16  ;;  %s199_s20 = scalar_lea.vmem %s148_s17, 32 }
  0xf3   :  { %p196_p8 = scmp.ne.s32.totalorder %s148_s17, %s195_s19  ;;  %p200_p9 = scmp.lt.s32.totalorder %s148_s17, %s148_s17 }
  0xf4   :  { %p201_p10 = scmp.lt.s32.totalorder %s199_s20, %s195_s19 }
  0xf6   :  { %p202_p11 = por %p201_p10, %p200_p9 }
  0xf8   :  { %p203_p12 = pnand %p202_p11, %p196_p8 }
 0x174   :  { %v121_v49 = vpop.xlane.xlu1 %120 }
 0x175   :  { %v122_v50 = vrot.slane %v121_v49, 4 }
 0x177   :  { %v123_v51 = vadd.f32 %v122_v50, %v121_v49 }
 0x179   :  { %v124_v52 = vrot.slane %v123_v51, 2 }
 0x17b   :  { %v125_v53 = vadd.f32 %v124_v52, %v123_v51 }
 0x17d   :  { %v126_v54 = vrot.slane %v125_v53, 1 }
 0x17f   :  { %v127_v55 = vadd.f32 %v126_v54, %v125_v53 }
 0x181   :  { %159 = vpush %v127_v55 }
 0x1b2   :  { %s160_s18 = spop %159 }
 0x1b3   :  { %v129_v56 = vstv %s160_s18 }
 0x1b4   :  { %130 = vst [vmem:[#allocation5] sm:$0x1] %v129_v56 }
 0x1b5   :  { %206 = shalt.err (!%p203_p12)
}
 0x1b6   :  { %s207_s22 = scalar_lea.hbm %s304_s5, 16 }
 0x1b7   :  { %p208_p13 = scmp.ne.s32.totalorder %s304_s5, %s207_s22  ;;  %p211_p0 = scmp.lt.u32.totalorder %s207_s22, %s304_s5 }
 0x1b9   :  { %p213_p1 = pnand %p211_p0, %p208_p13 }
 0x1bb   :  { %216 = shalt.err (!%p213_p1)
}
 0x1bc   :  { %150 = dma.vmem_to_hbm [thread:$0]  %s148_s17, 16, %s304_s5, [#allocation6]  }
 0x1bd   :  { %217 = dma.done.wait [#allocation4], 16  }
 0x1be   :  { %218 = vsyncadd [#allocation4], 4294967280 }
 0x1bf   :  { %219 = dma.done.wait [#allocation6], 16  }
 0x1c0   :  { %220 = vsyncadd [#allocation6], 4294967280 }
 0x1c1   :  { %157 = vsyncpa [#allocation4], 1 }
 0x1c2   :  { %158 = vsyncpa [#allocation6], 1 }

</bundles_post_ra>
